<compile_context>
chip_gen: v6e
topology: v6e:2x2x1
jax: 0.10.0
libtpu: 0.0.40
codegen_flags: <defaults>
</compile_context>

<pallas_src>
import functools

import jax
import jax.numpy as jnp
from jax import lax
from jax.experimental import pallas as pl
from jax.experimental.pallas import tpu as pltpu

LANES = 128
_TARGET_TILE_ROWS = 2048   # ~1 MiB f32 block per input: per-step overhead <~15%


def _fold_rows_to_8(v):
    """Sum an (rows, LANES) f32 value down to (8, LANES) with VPU adds only.

    rows must be a multiple of 8.  Uses up to 8 independent partial
    accumulators so the dependent-add chain stays short and overlaps with the
    elementwise work on the other vregs.
    """
    rows = v.shape[0]
    n = rows // 8
    k = min(8, n)
    parts = [v[c * 8:(c + 1) * 8, :] for c in range(k)]
    for c in range(k, n):
        parts[c % k] = parts[c % k] + v[c * 8:(c + 1) * 8, :]
    out = parts[0]
    for c in range(1, k):
        out = out + parts[c]
    return out


def _chess_eval_loss_kernel(o_ref, t_ref, out_ref, *, power, inv_power,
                            valid_rows, tile_rows, tiles_per_shard, n_tiles,
                            has_partial):
    p = pl.program_id(0)   # shard axis ("parallel")
    i = pl.program_id(1)   # reduction axis ("arbitrary")

    @pl.when(i == 0)
    def _():
        out_ref[...] = jnp.zeros_like(out_ref)

    # Cast inside the kernel (VPU work hidden under DMA); inputs stay in their
    # native dtype in HBM.
    o = o_ref[...].astype(jnp.float32)
    t = t_ref[...].astype(jnp.float32)

    abs_o = jnp.abs(o)
    abs_t = jnp.abs(t)
    diff = jnp.abs(o - t)

    # torch.sign(o) == torch.sign(t) without two sign() expansions:
    # true iff strictly same sign, or both exactly zero.
    same_sign = (o * t > 0.0) | ((o == 0.0) & (t == 0.0))

    # same-sign branch: |o - t| / (1 + min(|t|, |o|)).  Approx reciprocal runs
    # on the otherwise-idle EUP slot; one Newton step keeps ~1e-8 rel error.
    denom = 1.0 + jnp.minimum(abs_t, abs_o)
    r = pl.reciprocal(denom, approx=True)
    r = r * (2.0 - denom * r)
    branch_same = diff * r

    # different-sign branch: d**power if d > 1 else (d**1) / power
    if power == float(int(power)) and 1.0 <= power <= 4.0:
        # integer exponent -> VPU multiplies, no EUP transcendentals
        pow_term = diff
        for _ in range(int(power) - 1):
            pow_term = pow_term * diff
    else:
        pow_term = jnp.power(diff, power)
    branch_diff = jnp.where(diff > 1.0, pow_term, diff * inv_power)

    val = jnp.where(same_sign, branch_same, branch_diff)

    tile_idx = p * tiles_per_shard + i
    if has_partial:
        # Only the single, global-last tile overlaps the end of the [R,128]
        # slab; mask its invalid rows.  Full tiles take the cheap branch.
        is_partial = tile_idx == (n_tiles - 1)

        @pl.when(jnp.logical_not(is_partial))
        def _():
            out_ref[...] += _fold_rows_to_8(val)

        @pl.when(is_partial)
        def _():
            limit = valid_rows - tile_idx * tile_rows
            row_id = lax.broadcasted_iota(jnp.int32, val.shape, 0)
            out_ref[...] += _fold_rows_to_8(
                jnp.where(row_id < limit, val, 0.0))
    else:
        out_ref[...] += _fold_rows_to_8(val)


def _loss_values_ref(outputs, targets, power):
    """Elementwise loss values, mirroring the PyTorch forward exactly."""
    o = outputs.astype(jnp.float32)
    t = targets.astype(jnp.float32)
    diff = jnp.abs(o - t)
    same = jnp.sign(o) == jnp.sign(t)
    branch_same = diff / (1.0 + jnp.minimum(jnp.abs(t), jnp.abs(o)))
    branch_diff = jnp.where(diff > 1.0, diff ** power, diff ** 1 / power)
    return jnp.where(same, branch_same, branch_diff)


def chess_eval_loss_ref(outputs, targets, power: float = 2.0):
    """Pure-JAX reference."""
    return jnp.mean(_loss_values_ref(outputs, targets, power))


def chess_eval_loss(outputs: jax.Array, targets: jax.Array,
                    power: float = 2.0) -> jax.Array:
    """Pallas implementation of ChessEvalLoss.forward. Returns a scalar."""
    assert outputs.shape == targets.shape
    total = int(outputs.size)
    assert total > 0

    itemsize = min(outputs.dtype.itemsize, targets.dtype.itemsize)
    pack = max(8, 32 // itemsize)         # sublane multiple: 8 f32 / 16 bf16

    R = total // LANES                    # number of complete 128-lane rows
    lane_rem = total % LANES

    # Tiny inputs (< pack rows): pure JAX, negligible cost.
    if R < pack:
        return jnp.mean(_loss_values_ref(outputs, targets, power))

    o_flat = outputs.reshape(-1)
    t_flat = targets.reshape(-1)

    if lane_rem:
        # <=127 trailing elements that do not fill a 128-lane row: pure JAX.
        o_tail = o_flat[R * LANES:]
        t_tail = t_flat[R * LANES:]
        tail_sum = jnp.sum(_loss_values_ref(o_tail, t_tail, power))
        # TODO(synk): this bulk slice is a copy; a manual-DMA (pl.ANY) path
        # over the flat arrays would make ragged totals zero-copy too.
        o_bulk = o_flat[:R * LANES]
        t_bulk = t_flat[:R * LANES]
    else:
        tail_sum = jnp.zeros((), jnp.float32)
        o_bulk = o_flat                   # free reshape path, zero extra HBM traffic
        t_bulk = t_flat

    o2d = o_bulk.reshape(R, LANES)
    t2d = t_bulk.reshape(R, LANES)

    # --- tiling: blocks are always a multiple of `pack` rows and never larger
    # than R, so the only irregular block is a standard partial LAST block,
    # handled by the in-kernel row mask. -------------------------------------
    if R % pack == 0:
        tile_rows = min(_TARGET_TILE_ROWS, R)
    else:
        tile_rows = min(_TARGET_TILE_ROWS, (R // pack) * pack)
    n_tiles = -(-R // tile_rows)
    has_partial = (R % tile_rows) != 0
    g = 2 if (n_tiles >= 2 and n_tiles % 2 == 0) else 1
    tiles_per_shard = n_tiles // g

    kernel = functools.partial(
        _chess_eval_loss_kernel,
        power=float(power),
        inv_power=1.0 / float(power),
        valid_rows=R,
        tile_rows=tile_rows,
        tiles_per_shard=tiles_per_shard,
        n_tiles=n_tiles,
        has_partial=has_partial,
    )

    in_map = lambda p, i: (p * tiles_per_shard + i, 0)

    partial_sums = pl.pallas_call(
        kernel,
        out_shape=jax.ShapeDtypeStruct((g * 8, LANES), jnp.float32),
        grid_spec=pltpu.PrefetchScalarGridSpec(
            num_scalar_prefetch=0,
            grid=(g, tiles_per_shard),
            in_specs=[
                pl.BlockSpec((tile_rows, LANES), in_map),
                pl.BlockSpec((tile_rows, LANES), in_map),
            ],
            out_specs=pl.BlockSpec((8, LANES), lambda p, i: (p, 0)),
        ),
        compiler_params=pltpu.CompilerParams(
            # TODO(synk): on v7x, consider pltpu.CORE_PARALLEL on axis 0 so the
            # two shards provably land on both TensorCores.
            dimension_semantics=("parallel", "arbitrary"),
        ),
    )(o2d, t2d)

    return (jnp.sum(partial_sums) + tail_sum) / jnp.float32(total)


if __name__ == "__main__":
    key = jax.random.PRNGKey(0)
    k1, k2, k3, k4, k5, k6 = jax.random.split(key, 6)

    # Primary small example: (batch=2, channels=4, 16, 16) = 2048 elements.
    outputs = jax.random.normal(k1, (2, 4, 16, 16), dtype=jnp.float32) * 2.0
    targets = jax.random.normal(k2, (2, 4, 16, 16), dtype=jnp.float32) * 2.0
    loss = jax.block_until_ready(chess_eval_loss(outputs, targets, power=2.0))
    ref = chess_eval_loss_ref(outputs, targets, power=2.0)
    assert jnp.allclose(loss, ref, rtol=1e-5, atol=1e-6), (loss, ref)

    # Multi-tile, 2-shard, masked-partial-tile f32 path (7000 rows, no pad).
    o3 = jax.random.normal(k3, (7000, 128), dtype=jnp.float32) * 2.0
    t3 = jax.random.normal(k4, (7000, 128), dtype=jnp.float32) * 2.0
    loss3 = jax.block_until_ready(chess_eval_loss(o3, t3, power=2.0))
    ref3 = chess_eval_loss_ref(o3, t3, power=2.0)
    assert jnp.allclose(loss3, ref3, rtol=1e-4, atol=1e-5), (loss3, ref3)

    # Ragged bf16 path: lane tail (total % 128 == 6) + masked partial tile.
    o4 = (jax.random.normal(k5, (3, 513, 130), dtype=jnp.float32) * 2.0
          ).astype(jnp.bfloat16)
    t4 = (jax.random.normal(k6, (3, 513, 130), dtype=jnp.float32) * 2.0
          ).astype(jnp.bfloat16)
    loss4 = jax.block_until_ready(chess_eval_loss(o4, t4, power=2.0))
    ref4 = chess_eval_loss_ref(o4, t4, power=2.0)
    assert jnp.allclose(loss4, ref4, rtol=1e-3, atol=1e-4), (loss4, ref4)

    print("KERNEL_OK")
</pallas_src>

<mosaic_0001>
module attributes {stable_mosaic.version = 11 : i64} {
  func.func @_chess_eval_loss_kernel(%arg0: i32, %arg1: i32, %arg2: memref<16x128xf32, #tpu.memory_space<vmem>>, %arg3: memref<16x128xf32, #tpu.memory_space<vmem>>, %arg4: memref<8x128xf32, #tpu.memory_space<vmem>>) attributes {dimension_semantics = [#tpu.dimension_semantics<parallel>, #tpu.dimension_semantics<arbitrary>], iteration_bounds = array<i64: 1, 1>, scalar_prefetch = 0 : i64, scratch_operands = 0 : i64, tpu.core_type = #tpu.core_type<tc>, window_params = [{transform_indices = @transform_0, window_bounds = array<i64: 16, 128>}, {transform_indices = @transform_1, window_bounds = array<i64: 16, 128>}, {transform_indices = @transform_2, window_bounds = array<i64: 8, 128>}]} {
    %c0_i32 = arith.constant 0 : i32
    %0 = arith.cmpi eq, %arg1, %c0_i32 : i32
    %1 = arith.extui %0 : i1 to i32
    %c0_i32_0 = arith.constant 0 : i32
    %2 = arith.cmpi ne, %1, %c0_i32_0 : i32
    scf.if %2 {
      %cst_14 = arith.constant 0.000000e+00 : f32
      %40 = vector.broadcast %cst_14 : f32 to vector<8x128xf32>
      %c0_15 = arith.constant 0 : index
      %c0_16 = arith.constant 0 : index
      %41 = vector.load %arg4[%c0_15, %c0_16] : memref<8x128xf32, #tpu.memory_space<vmem>>, vector<8x128xf32>
      tpu.vector_store %arg4[%c0_15, %c0_16], %40 {strides = array<i32>} : memref<8x128xf32, #tpu.memory_space<vmem>>, vector<8x128xf32>,
    } else {
    }
    %c0 = arith.constant 0 : index
    %c0_1 = arith.constant 0 : index
    %3 = vector.load %arg2[%c0, %c0_1] : memref<16x128xf32, #tpu.memory_space<vmem>>, vector<16x128xf32>
    %c0_2 = arith.constant 0 : index
    %c0_3 = arith.constant 0 : index
    %4 = vector.load %arg3[%c0_2, %c0_3] : memref<16x128xf32, #tpu.memory_space<vmem>>, vector<16x128xf32>
    %5 = math.absf %3 : vector<16x128xf32>
    %6 = math.absf %4 : vector<16x128xf32>
    %7 = arith.subf %3, %4 : vector<16x128xf32>
    %8 = math.absf %7 : vector<16x128xf32>
    %9 = arith.mulf %3, %4 : vector<16x128xf32>
    %cst = arith.constant 0.000000e+00 : f32
    %10 = vector.broadcast %cst : f32 to vector<16x128xf32>
    %11 = arith.cmpf ogt, %9, %10 : vector<16x128xf32>
    %cst_4 = arith.constant 0.000000e+00 : f32
    %12 = vector.broadcast %cst_4 : f32 to vector<16x128xf32>
    %13 = arith.cmpf oeq, %3, %12 : vector<16x128xf32>
    %cst_5 = arith.constant 0.000000e+00 : f32
    %14 = vector.broadcast %cst_5 : f32 to vector<16x128xf32>
    %15 = arith.cmpf oeq, %4, %14 : vector<16x128xf32>
    %16 = arith.andi %13, %15 : vector<16x128xi1>
    %17 = arith.ori %11, %16 : vector<16x128xi1>
    %18 = arith.minimumf %6, %5 : vector<16x128xf32>
    %cst_6 = arith.constant 1.000000e+00 : f32
    %19 = vector.broadcast %cst_6 : f32 to vector<16x128xf32>
    %20 = arith.addf %19, %18 : vector<16x128xf32>
    %21 = tpu.reciprocal %20 {approx = true} : vector<16x128xf32> -> vector<16x128xf32>
    %22 = arith.mulf %20, %21 : vector<16x128xf32>
    %cst_7 = arith.constant 2.000000e+00 : f32
    %23 = vector.broadcast %cst_7 : f32 to vector<16x128xf32>
    %24 = arith.subf %23, %22 : vector<16x128xf32>
    %25 = arith.mulf %21, %24 : vector<16x128xf32>
    %26 = arith.mulf %8, %25 : vector<16x128xf32>
    %27 = arith.mulf %8, %8 : vector<16x128xf32>
    %cst_8 = arith.constant 1.000000e+00 : f32
    %28 = vector.broadcast %cst_8 : f32 to vector<16x128xf32>
    %29 = arith.cmpf ogt, %8, %28 : vector<16x128xf32>
    %cst_9 = arith.constant 5.000000e-01 : f32
    %30 = vector.broadcast %cst_9 : f32 to vector<16x128xf32>
    %31 = arith.mulf %8, %30 : vector<16x128xf32>
    %32 = arith.select %29, %27, %31 : vector<16x128xi1>, vector<16x128xf32>
    %33 = arith.select %17, %26, %32 : vector<16x128xi1>, vector<16x128xf32>
    %c0_10 = arith.constant 0 : index
    %c0_11 = arith.constant 0 : index
    %34 = vector.load %arg4[%c0_10, %c0_11] : memref<8x128xf32, #tpu.memory_space<vmem>>, vector<8x128xf32>
    %35 = vector.extract_strided_slice %33 {offsets = [0, 0], sizes = [8, 128], strides = [1, 1]} : vector<16x128xf32> to vector<8x128xf32>
    %36 = vector.extract_strided_slice %33 {offsets = [8, 0], sizes = [8, 128], strides = [1, 1]} : vector<16x128xf32> to vector<8x128xf32>
    %37 = arith.addf %35, %36 : vector<8x128xf32>
    %38 = arith.addf %34, %37 : vector<8x128xf32>
    %c0_12 = arith.constant 0 : index
    %c0_13 = arith.constant 0 : index
    %39 = vector.load %arg4[%c0_12, %c0_13] : memref<8x128xf32, #tpu.memory_space<vmem>>, vector<8x128xf32>
    tpu.vector_store %arg4[%c0_12, %c0_13], %38 {strides = array<i32>} : memref<8x128xf32, #tpu.memory_space<vmem>>, vector<8x128xf32>,
    return
  }
  func.func @transform_0(%arg0: i32, %arg1: i32) -> (i32, i32) {
    %c1_i32 = arith.constant 1 : i32
    %0 = arith.muli %arg0, %c1_i32 : i32
    %1 = arith.addi %0, %arg1 : i32
    %c0_i32 = arith.constant 0 : i32
    %c0_i32_0 = arith.constant 0 : i32
    return %1, %c0_i32 : i32, i32
  }
  func.func @transform_1(%arg0: i32, %arg1: i32) -> (i32, i32) {
    %c1_i32 = arith.constant 1 : i32
    %0 = arith.muli %arg0, %c1_i32 : i32
    %1 = arith.addi %0, %arg1 : i32
    %c0_i32 = arith.constant 0 : i32
    %c0_i32_0 = arith.constant 0 : i32
    return %1, %c0_i32 : i32, i32
  }
  func.func @transform_2(%arg0: i32, %arg1: i32) -> (i32, i32) {
    %c0_i32 = arith.constant 0 : i32
    %c0_i32_0 = arith.constant 0 : i32
    return %arg0, %c0_i32 : i32, i32
  }
}

</mosaic_0001>

<bundles_post_ra>
// kernel: tpu_custom_call.1
= control target key start
LH: loop header
LB: loop body
LE: loop exit
PB: predicated region body
PF: predicated region fallthrough
CT: control target
= control target key end

     0   :  { %7 = vsyncpa [#allocation3], 0  ;;  %s230_s0 = inlined_call_operand.hbm [shape: f32[16,128], index: 0, kind: input, shape index: {}]   ;;  %s231_s1 = inlined_call_operand.hbm [shape: f32[16,128], index: 1, kind: input, shape index: {}]   ;;  %s232_s2 = inlined_call_operand.hbm [shape: f32[8,128], index: 2, kind: output, shape index: {}]  }
   0x1   :  { %8 = vsyncpa [#allocation6], 0 }
   0x2   :  { %9 = vsyncpa [#allocation4], 0  ;;  %s201_s9 = smov [#allocation2]  }
   0x3   :  { %s19_s10 = sshll.u32 %s201_s9, 4  ;;  %s20_s10 = int_to_ptr.vmem [resolvable:$true] %s19_s10 }
   0x4   :  { %s143_s11 = scalar_lea.vmem %s20_s10, 256  ;;  %p148_p1 = scmp.lt.s32.totalorder %s20_s10, %s20_s10 }
   0x5   :  { %p144_p0 = scmp.ne.s32.totalorder %s20_s10, %s143_s11  ;;  %p149_p2 = scmp.lt.s32.totalorder %s143_s11, %s143_s11 }
   0x7   :  { %p150_p3 = por %p149_p2, %p148_p1 }
   0x9   :  { %p151_p4 = pnand %p150_p3, %p144_p0 }
   0xb   :  { %154 = shalt.err (!%p151_p4)
}
   0xc   :  { %s202_s12 = smov 128   ;;  %s203_s13 = smov 8  }
   0xd   :  { %25 = dma.hbm_to_vmem [thread:$0]  %s230_s0, 256, %s20_s10, [#allocation3], %s202_s12, %s202_s12, %s203_s13  }
   0xe   :  { %s204_s16 = smov [#allocation5]  }
   0xf   :  { %s35_s17 = sshll.u32 %s204_s16, 4  ;;  %s36_s17 = int_to_ptr.vmem [resolvable:$true] %s35_s17 }
  0x10   :  { %s163_s18 = scalar_lea.vmem %s36_s17, 256  ;;  %p168_p6 = scmp.lt.s32.totalorder %s36_s17, %s36_s17 }
  0x11   :  { %p164_p5 = scmp.ne.s32.totalorder %s36_s17, %s163_s18  ;;  %p169_p7 = scmp.lt.s32.totalorder %s163_s18, %s163_s18 }
  0x13   :  { %p170_p8 = por %p169_p7, %p168_p6 }
  0x15   :  { %p171_p9 = pnand %p170_p8, %p164_p5 }
  0x17   :  { %174 = shalt.err (!%p171_p9)
}
  0x18   :  { %41 = dma.hbm_to_vmem [thread:$0]  %s231_s1, 256, %s36_s17, [#allocation6], %s202_s12, %s202_s12, %s203_s13  }
  0x19   :  { %195 = dma.done.wait [#allocation3], 256  }
  0x1a   :  { %196 = vsyncadd [#allocation3], 4294967040 }
  0x1b   :  { %197 = dma.done.wait [#allocation6], 256  }
  0x1c   :  { %198 = vsyncadd [#allocation6], 4294967040  ;;  %v57_v0 = vld [vmem:[#allocation2] sm:$0xff]  ;;  %v58_v1 = vld [vmem:[#allocation2 + $0x8] sm:$0xff]  ;;  %s205_s0 = smov [#allocation7]  }
  0x1d   :  { %v59_v2 = vld [vmem:[#allocation5] sm:$0xff]  ;;  %v60_v3 = vld [vmem:[#allocation5 + $0x8] sm:$0xff]  ;;  %v61_v4 = vand.u32 2147483647, %v57_v0  ;;  %v62_v5 = vand.u32 2147483647, %v58_v1 }
  0x1e   :  { %v63_v6 = vand.u32 2147483647, %v59_v2  ;;  %v64_v7 = vand.u32 2147483647, %v60_v3  ;;  %v65_v12 = vsub.f32 %v57_v0, %v59_v2  ;;  %v66_v13 = vsub.f32 %v58_v1, %v60_v3  ;;  %s115_s1 = sshll.u32 %s205_s0, 4  ;;  %s116_s1 = int_to_ptr.vmem [resolvable:$true] %s115_s1 }
  0x1f   :  { %v69_v15 = vmul.f32 %v59_v2, %v57_v0  ;;  %v70_v18 = vmul.f32 %v60_v3, %v58_v1  ;;  %vm73_vm0 = vcmp.eq.f32.partialorder %v57_v0, 0.0  ;;  %vm75_vm1 = vcmp.eq.f32.partialorder %v59_v2, 0.0  ;;  %s175_s21 = scalar_lea.vmem %s116_s1, 128  ;;  %p180_p11 = scmp.lt.s32.totalorder %s116_s1, %s116_s1 }
  0x20   :  { %v81_v8 = vmin.f32 %v63_v6, %v61_v4  ;;  %v82_v9 = vmin.f32 %v64_v7, %v62_v5  ;;  %v67_v14 = vand.u32 2147483647, %v65_v12  ;;  %v68_v16 = vand.u32 2147483647, %v66_v13  ;;  %vm77_vm5 = vmand %vm73_vm0, %vm75_vm1  ;;  %p176_p10 = scmp.ne.s32.totalorder %s116_s1, %s175_s21  ;;  %p181_p12 = scmp.lt.s32.totalorder %s175_s21, %s175_s21 }
  0x21   :  { %vm74_vm2 = vcmp.eq.f32.partialorder %v58_v1, 0.0  ;;  %vm76_vm3 = vcmp.eq.f32.partialorder %v60_v3, 0.0  ;;  %vm71_vm4 = vcmp.gt.f32.partialorder %v69_v15, 0.0  ;;  %vm72_vm7 = vcmp.gt.f32.partialorder %v70_v18, 0.0 }
  0x22   :  { %v83_v10 = vadd.f32 1.0, %v81_v8  ;;  %v84_v11 = vadd.f32 1.0, %v82_v9  ;;  %v95_v22 = vmul.f32 %v67_v14, %v67_v14  ;;  %v99_v23 = vmul.f32 0.5, %v67_v14  ;;  %vm78_vm8 = vmand %vm74_vm2, %vm76_vm3  ;;  %p182_p13 = por %p181_p12, %p180_p11 }
  0x23   :  { %v96_v25 = vmul.f32 %v68_v16, %v68_v16  ;;  %vm97_vm6 = vcmp.gt.f32.partialorder %v67_v14, 1.0  ;;  %v100_v26 = vmul.f32 0.5, %v68_v16  ;;  %vm98_vm9 = vcmp.gt.f32.partialorder %v68_v16, 1.0  ;;  %vm79_vm10 = vmor %vm71_vm4, %vm77_vm5 }
  0x24   :  { %131 = vrcp.f32 %v83_v10  ;;  %v101_v30 = vsel %vm97_vm6, %v95_v22, %v99_v23  ;;  %vm80_vm11 = vmor %vm72_vm7, %vm78_vm8  ;;  %p183_p0 = pnand %p182_p13, %p176_p10 }
  0x25   :  { %133 = vrcp.f32 %v84_v11  ;;  %v102_v32 = vsel %vm98_vm9, %v96_v25, %v100_v26 }
  0x31   :  { %v132_v17 = vpop.eup %131 }
  0x32   :  { %v134_v19 = vpop.eup %133  ;;  %v87_v20 = vmul.f32 %v132_v17, %v83_v10 }
  0x33   :  { %v88_v21 = vmul.f32 %v134_v19, %v84_v11 }
  0x34   :  { %v89_v24 = vsub.f32 2.0, %v87_v20 }
  0x35   :  { %v90_v27 = vsub.f32 2.0, %v88_v21 }
  0x36   :  { %v91_v28 = vmul.f32 %v132_v17, %v89_v24 }
  0x37   :  { %v92_v29 = vmul.f32 %v134_v19, %v90_v27 }
  0x38   :  { %v93_v31 = vmul.f32 %v91_v28, %v67_v14 }
  0x39   :  { %v94_v33 = vmul.f32 %v92_v29, %v68_v16 }
  0x3a   :  { %v103_v34 = vsel %vm79_vm10, %v93_v31, %v101_v30 }
  0x3b   :  { %v104_v35 = vsel %vm80_vm11, %v94_v33, %v102_v32 }
  0x3c   :  { %v106_v36 = vadd.f32 %v104_v35, %v103_v34 }
  0x3e   :  { %108 = vst [vmem:[#allocation7] sm:$0xff] %v106_v36 }
  0x3f   :  { %186 = shalt.err (!%p183_p0)
}
  0x40   :  { %118 = dma.vmem_to_hbm [thread:$0]  %s116_s1, 128, %s232_s2, [#allocation4]  }
  0x41   :  { %199 = dma.done.wait [#allocation4], 128  }
  0x42   :  { %200 = vsyncadd [#allocation4], 4294967168 }
  0x43   :  { %122 = vsyncpa [#allocation3], 1 }
  0x44   :  { %123 = vsyncpa [#allocation6], 1 }
  0x45   :  { %124 = vsyncpa [#allocation4], 1 }

</bundles_post_ra>
